<compile_context>
chip_gen: v7x
topology: tpu7x:2x2x1
jax: 0.10.0
libtpu: 0.0.40
codegen_flags: <defaults>
</compile_context>

<pallas_src>
import jax
import jax.numpy as jnp
from jax.experimental import pallas as pl
from jax.experimental.pallas import tpu as pltpu

LANE = 128


def _round_up(v, m):
    return (v + m - 1) // m * m


def _mlp_kernel(x_ref,
                w1_ref, b1_ref,
                w2_ref, b2_ref,
                w3_ref, b3_ref,
                w4_ref, b4_ref,
                w5_ref, b5_ref,
                o_ref):
    # One batch tile of activations in VMEM; all (padded) weights fully resident.
    # bf16 feeds the MXU, accumulation and elementwise math stay in f32.
    h = x_ref[...]                                                            # bf16 [tb, 128]
    h = jnp.dot(h, w1_ref[...], preferred_element_type=jnp.float32) + b1_ref[...]
    h = jnp.maximum(h, 0.0).astype(jnp.bfloat16)
    h = jnp.dot(h, w2_ref[...], preferred_element_type=jnp.float32) + b2_ref[...]
    h = jnp.maximum(h, 0.0).astype(jnp.bfloat16)
    h = jnp.dot(h, w3_ref[...], preferred_element_type=jnp.float32) + b3_ref[...]
    h = jnp.maximum(h, 0.0).astype(jnp.bfloat16)
    h = jnp.dot(h, w4_ref[...], preferred_element_type=jnp.float32) + b4_ref[...]
    h = jnp.maximum(h, 0.0).astype(jnp.bfloat16)
    logits = jnp.dot(h, w5_ref[...], preferred_element_type=jnp.float32) + b5_ref[...]
    o_ref[...] = jax.nn.sigmoid(logits)                                       # f32, lane-dense


def nn_model_forward(x, params, *, block_b=512):
    """Fused forward pass of NNModel.

    x: [B, num_feature] float32
    params: list of (W, b) with W shaped [in, out], b shaped [1, out]
    returns: [B, num_classes] float32 (sigmoid probabilities)
    """
    B, F = x.shape
    num_classes = params[-1][0].shape[1]

    # Padded feature dims: every contraction / output dim becomes a multiple of 128.
    dims = [F] + [w.shape[1] for (w, _) in params]
    pdims = [_round_up(d, LANE) for d in dims]

    # Batch tile: large enough to fill MXU rows, capped by (padded) batch size.
    eff_block = max(8, min(block_b, _round_up(B, LANE)))
    B_pad = _round_up(B, eff_block)

    # One-time host-side padding (zeros => padded columns stay exactly 0 through ReLU layers;
    # padded output columns give sigmoid(0)=0.5 and are sliced away below).
    x_p = jnp.zeros((B_pad, pdims[0]), jnp.bfloat16).at[:B, :F].set(x.astype(jnp.bfloat16))

    flat_params = []
    in_specs = [pl.BlockSpec((eff_block, pdims[0]), lambda i: (i, 0))]
    flops = 0
    for li, (w, b) in enumerate(params):
        kin, kout = pdims[li], pdims[li + 1]
        w_p = jnp.zeros((kin, kout), jnp.bfloat16).at[:w.shape[0], :w.shape[1]].set(
            w.astype(jnp.bfloat16))
        b_p = jnp.zeros((1, kout), jnp.float32).at[:, :b.shape[1]].set(b.astype(jnp.float32))
        flat_params += [w_p, b_p]
        in_specs += [pl.BlockSpec((kin, kout), lambda i: (0, 0)),
                     pl.BlockSpec((1, kout), lambda i: (0, 0))]
        flops += 2 * B_pad * kin * kout

    out_cols = pdims[-1]
    out_spec = pl.BlockSpec((eff_block, out_cols), lambda i: (i, 0))

    bytes_accessed = (x_p.size * x_p.dtype.itemsize
                      + sum(a.size * a.dtype.itemsize for a in flat_params)
                      + B_pad * out_cols * 4)
    cost = pl.CostEstimate(flops=flops,
                           transcendentals=B_pad * out_cols,
                           bytes_accessed=bytes_accessed)

    out_padded = pl.pallas_call(
        _mlp_kernel,
        out_shape=jax.ShapeDtypeStruct((B_pad, out_cols), jnp.float32),
        grid_spec=pltpu.PrefetchScalarGridSpec(
            num_scalar_prefetch=0,
            grid=(B_pad // eff_block,),
            in_specs=in_specs,
            out_specs=out_spec,
        ),
        compiler_params=pltpu.CompilerParams(
            dimension_semantics=("parallel",),
        ),
        cost_estimate=cost,
    )(x_p, *flat_params)

    return out_padded[:B, :num_classes]


def init_params(key, num_feature, num_classes):
    """Deterministic init matching the layer shapes of NNModel (weights stored [in, out])."""
    cfg = [64, 128, 128, 64, num_classes]
    params = []
    last = num_feature
    for n in cfg:
        key, kw, kb = jax.random.split(key, 3)
        bound = 1.0 / jnp.sqrt(last)
        w = jax.random.uniform(kw, (last, n), jnp.float32, -bound, bound)
        b = jax.random.uniform(kb, (1, n), jnp.float32, -bound, bound)
        params.append((w, b))
        last = n
    return params


def reference_forward(x, params):
    h = x
    for i, (w, b) in enumerate(params):
        h = h @ w + b
        if i != len(params) - 1:
            h = jnp.maximum(h, 0.0)
    return jax.nn.sigmoid(h)


if __name__ == "__main__":
    num_feature = 32
    num_classes = 4
    batch = 128

    key = jax.random.PRNGKey(0)
    key, kx = jax.random.split(key)
    x = jax.random.normal(kx, (batch, num_feature), jnp.float32)
    params = init_params(key, num_feature, num_classes)

    out = nn_model_forward(x, params)
    out = jax.block_until_ready(out)

    ref = reference_forward(x, params)
    assert out.shape == (batch, num_classes)
    # bf16 matmul inputs (f32 accumulation) -> loosened tolerance vs the pure-f32 reference.
    assert jnp.allclose(out, ref, atol=2e-2, rtol=2e-2), float(jnp.max(jnp.abs(out - ref)))

    print("KERNEL_OK")
</pallas_src>

<mosaic_0001>
module attributes {stable_mosaic.version = 11 : i64} {
  func.func @_mlp_kernel(%arg0: i32, %arg1: memref<128x128xbf16, #tpu.memory_space<vmem>>, %arg2: memref<128x128xbf16, #tpu.memory_space<vmem>>, %arg3: memref<1x128xf32, #tpu.memory_space<vmem>>, %arg4: memref<128x128xbf16, #tpu.memory_space<vmem>>, %arg5: memref<1x128xf32, #tpu.memory_space<vmem>>, %arg6: memref<128x128xbf16, #tpu.memory_space<vmem>>, %arg7: memref<1x128xf32, #tpu.memory_space<vmem>>, %arg8: memref<128x128xbf16, #tpu.memory_space<vmem>>, %arg9: memref<1x128xf32, #tpu.memory_space<vmem>>, %arg10: memref<128x128xbf16, #tpu.memory_space<vmem>>, %arg11: memref<1x128xf32, #tpu.memory_space<vmem>>, %arg12: memref<128x128xf32, #tpu.memory_space<vmem>>) attributes {dimension_semantics = [#tpu.dimension_semantics<parallel>], iteration_bounds = array<i64: 1>, scalar_prefetch = 0 : i64, scratch_operands = 0 : i64, tpu.core_type = #tpu.core_type<tc>, window_params = [{transform_indices = @transform_0, window_bounds = array<i64: 128, 128>}, {pipeline_mode = #tpu.pipeline_mode<synchronous>, transform_indices = @transform_1, window_bounds = array<i64: 128, 128>}, {pipeline_mode = #tpu.pipeline_mode<synchronous>, transform_indices = @transform_2, window_bounds = array<i64: 1, 128>}, {pipeline_mode = #tpu.pipeline_mode<synchronous>, transform_indices = @transform_3, window_bounds = array<i64: 128, 128>}, {pipeline_mode = #tpu.pipeline_mode<synchronous>, transform_indices = @transform_4, window_bounds = array<i64: 1, 128>}, {pipeline_mode = #tpu.pipeline_mode<synchronous>, transform_indices = @transform_5, window_bounds = array<i64: 128, 128>}, {pipeline_mode = #tpu.pipeline_mode<synchronous>, transform_indices = @transform_6, window_bounds = array<i64: 1, 128>}, {pipeline_mode = #tpu.pipeline_mode<synchronous>, transform_indices = @transform_7, window_bounds = array<i64: 128, 128>}, {pipeline_mode = #tpu.pipeline_mode<synchronous>, transform_indices = @transform_8, window_bounds = array<i64: 1, 128>}, {pipeline_mode = #tpu.pipeline_mode<synchronous>, transform_indices = @transform_9, window_bounds = array<i64: 128, 128>}, {pipeline_mode = #tpu.pipeline_mode<synchronous>, transform_indices = @transform_10, window_bounds = array<i64: 1, 128>}, {transform_indices = @transform_11, window_bounds = array<i64: 128, 128>}]} {
    %c0 = arith.constant 0 : index
    %c0_0 = arith.constant 0 : index
    %0 = vector.load %arg1[%c0, %c0_0] : memref<128x128xbf16, #tpu.memory_space<vmem>>, vector<128x128xbf16>
    %c0_1 = arith.constant 0 : index
    %c0_2 = arith.constant 0 : index
    %1 = vector.load %arg2[%c0_1, %c0_2] : memref<128x128xbf16, #tpu.memory_space<vmem>>, vector<128x128xbf16>
    %cst = arith.constant dense<0.000000e+00> : vector<128x128xf32>
    %2 = tpu.matmul %0, %1, %cst {dimension_numbers = #tpu.dot_dimension_numbers<[1], [0], [0], [1], [0, 0, 1, 1], [], []>} : vector<128x128xbf16>, vector<128x128xbf16>, vector<128x128xf32> -> vector<128x128xf32>
    %c0_3 = arith.constant 0 : index
    %c0_4 = arith.constant 0 : index
    %3 = vector.load %arg3[%c0_3, %c0_4] : memref<1x128xf32, #tpu.memory_space<vmem>>, vector<1x128xf32>
    %4 = vector.broadcast %3 : vector<1x128xf32> to vector<128x128xf32>
    %5 = arith.addf %2, %4 : vector<128x128xf32>
    %cst_5 = arith.constant 0.000000e+00 : f32
    %6 = vector.broadcast %cst_5 : f32 to vector<128x128xf32>
    %7 = arith.maximumf %5, %6 : vector<128x128xf32>
    %8 = arith.truncf %7 : vector<128x128xf32> to vector<128x128xbf16>
    %c0_6 = arith.constant 0 : index
    %c0_7 = arith.constant 0 : index
    %9 = vector.load %arg4[%c0_6, %c0_7] : memref<128x128xbf16, #tpu.memory_space<vmem>>, vector<128x128xbf16>
    %cst_8 = arith.constant dense<0.000000e+00> : vector<128x128xf32>
    %10 = tpu.matmul %8, %9, %cst_8 {dimension_numbers = #tpu.dot_dimension_numbers<[1], [0], [0], [1], [0, 0, 1, 1], [], []>} : vector<128x128xbf16>, vector<128x128xbf16>, vector<128x128xf32> -> vector<128x128xf32>
    %c0_9 = arith.constant 0 : index
    %c0_10 = arith.constant 0 : index
    %11 = vector.load %arg5[%c0_9, %c0_10] : memref<1x128xf32, #tpu.memory_space<vmem>>, vector<1x128xf32>
    %12 = vector.broadcast %11 : vector<1x128xf32> to vector<128x128xf32>
    %13 = arith.addf %10, %12 : vector<128x128xf32>
    %cst_11 = arith.constant 0.000000e+00 : f32
    %14 = vector.broadcast %cst_11 : f32 to vector<128x128xf32>
    %15 = arith.maximumf %13, %14 : vector<128x128xf32>
    %16 = arith.truncf %15 : vector<128x128xf32> to vector<128x128xbf16>
    %c0_12 = arith.constant 0 : index
    %c0_13 = arith.constant 0 : index
    %17 = vector.load %arg6[%c0_12, %c0_13] : memref<128x128xbf16, #tpu.memory_space<vmem>>, vector<128x128xbf16>
    %cst_14 = arith.constant dense<0.000000e+00> : vector<128x128xf32>
    %18 = tpu.matmul %16, %17, %cst_14 {dimension_numbers = #tpu.dot_dimension_numbers<[1], [0], [0], [1], [0, 0, 1, 1], [], []>} : vector<128x128xbf16>, vector<128x128xbf16>, vector<128x128xf32> -> vector<128x128xf32>
    %c0_15 = arith.constant 0 : index
    %c0_16 = arith.constant 0 : index
    %19 = vector.load %arg7[%c0_15, %c0_16] : memref<1x128xf32, #tpu.memory_space<vmem>>, vector<1x128xf32>
    %20 = vector.broadcast %19 : vector<1x128xf32> to vector<128x128xf32>
    %21 = arith.addf %18, %20 : vector<128x128xf32>
    %cst_17 = arith.constant 0.000000e+00 : f32
    %22 = vector.broadcast %cst_17 : f32 to vector<128x128xf32>
    %23 = arith.maximumf %21, %22 : vector<128x128xf32>
    %24 = arith.truncf %23 : vector<128x128xf32> to vector<128x128xbf16>
    %c0_18 = arith.constant 0 : index
    %c0_19 = arith.constant 0 : index
    %25 = vector.load %arg8[%c0_18, %c0_19] : memref<128x128xbf16, #tpu.memory_space<vmem>>, vector<128x128xbf16>
    %cst_20 = arith.constant dense<0.000000e+00> : vector<128x128xf32>
    %26 = tpu.matmul %24, %25, %cst_20 {dimension_numbers = #tpu.dot_dimension_numbers<[1], [0], [0], [1], [0, 0, 1, 1], [], []>} : vector<128x128xbf16>, vector<128x128xbf16>, vector<128x128xf32> -> vector<128x128xf32>
    %c0_21 = arith.constant 0 : index
    %c0_22 = arith.constant 0 : index
    %27 = vector.load %arg9[%c0_21, %c0_22] : memref<1x128xf32, #tpu.memory_space<vmem>>, vector<1x128xf32>
    %28 = vector.broadcast %27 : vector<1x128xf32> to vector<128x128xf32>
    %29 = arith.addf %26, %28 : vector<128x128xf32>
    %cst_23 = arith.constant 0.000000e+00 : f32
    %30 = vector.broadcast %cst_23 : f32 to vector<128x128xf32>
    %31 = arith.maximumf %29, %30 : vector<128x128xf32>
    %32 = arith.truncf %31 : vector<128x128xf32> to vector<128x128xbf16>
    %c0_24 = arith.constant 0 : index
    %c0_25 = arith.constant 0 : index
    %33 = vector.load %arg10[%c0_24, %c0_25] : memref<128x128xbf16, #tpu.memory_space<vmem>>, vector<128x128xbf16>
    %cst_26 = arith.constant dense<0.000000e+00> : vector<128x128xf32>
    %34 = tpu.matmul %32, %33, %cst_26 {dimension_numbers = #tpu.dot_dimension_numbers<[1], [0], [0], [1], [0, 0, 1, 1], [], []>} : vector<128x128xbf16>, vector<128x128xbf16>, vector<128x128xf32> -> vector<128x128xf32>
    %c0_27 = arith.constant 0 : index
    %c0_28 = arith.constant 0 : index
    %35 = vector.load %arg11[%c0_27, %c0_28] : memref<1x128xf32, #tpu.memory_space<vmem>>, vector<1x128xf32>
    %36 = vector.broadcast %35 : vector<1x128xf32> to vector<128x128xf32>
    %37 = arith.addf %34, %36 : vector<128x128xf32>
    %38 = arith.negf %37 : vector<128x128xf32>
    %39 = math.exp %38 : vector<128x128xf32>
    %cst_29 = arith.constant 1.000000e+00 : f32
    %40 = vector.broadcast %cst_29 : f32 to vector<128x128xf32>
    %41 = arith.addf %40, %39 : vector<128x128xf32>
    %42 = arith.divf %40, %41 : vector<128x128xf32>
    %c0_30 = arith.constant 0 : index
    %c0_31 = arith.constant 0 : index
    %43 = vector.load %arg12[%c0_30, %c0_31] : memref<128x128xf32, #tpu.memory_space<vmem>>, vector<128x128xf32>
    tpu.vector_store %arg12[%c0_30, %c0_31], %42 {strides = array<i32>} : memref<128x128xf32, #tpu.memory_space<vmem>>, vector<128x128xf32>,
    return
  }
  func.func @transform_0(%arg0: i32) -> (i32, i32) {
    %c0_i32 = arith.constant 0 : i32
    %c0_i32_0 = arith.constant 0 : i32
    return %arg0, %c0_i32 : i32, i32
  }
  func.func @transform_1(%arg0: i32) -> (i32, i32) {
    %c0_i32 = arith.constant 0 : i32
    %c0_i32_0 = arith.constant 0 : i32
    %c0_i32_1 = arith.constant 0 : i32
    return %c0_i32, %c0_i32_0 : i32, i32
  }
  func.func @transform_2(%arg0: i32) -> (i32, i32) {
    %c0_i32 = arith.constant 0 : i32
    %c0_i32_0 = arith.constant 0 : i32
    %c0_i32_1 = arith.constant 0 : i32
    return %c0_i32, %c0_i32_0 : i32, i32
  }
  func.func @transform_3(%arg0: i32) -> (i32, i32) {
    %c0_i32 = arith.constant 0 : i32
    %c0_i32_0 = arith.constant 0 : i32
    %c0_i32_1 = arith.constant 0 : i32
    return %c0_i32, %c0_i32_0 : i32, i32
  }
  func.func @transform_4(%arg0: i32) -> (i32, i32) {
    %c0_i32 = arith.constant 0 : i32
    %c0_i32_0 = arith.constant 0 : i32
    %c0_i32_1 = arith.constant 0 : i32
    return %c0_i32, %c0_i32_0 : i32, i32
  }
  func.func @transform_5(%arg0: i32) -> (i32, i32) {
    %c0_i32 = arith.constant 0 : i32
    %c0_i32_0 = arith.constant 0 : i32
    %c0_i32_1 = arith.constant 0 : i32
    return %c0_i32, %c0_i32_0 : i32, i32
  }
  func.func @transform_6(%arg0: i32) -> (i32, i32) {
    %c0_i32 = arith.constant 0 : i32
    %c0_i32_0 = arith.constant 0 : i32
    %c0_i32_1 = arith.constant 0 : i32
    return %c0_i32, %c0_i32_0 : i32, i32
  }
  func.func @transform_7(%arg0: i32) -> (i32, i32) {
    %c0_i32 = arith.constant 0 : i32
    %c0_i32_0 = arith.constant 0 : i32
    %c0_i32_1 = arith.constant 0 : i32
    return %c0_i32, %c0_i32_0 : i32, i32
  }
  func.func @transform_8(%arg0: i32) -> (i32, i32) {
    %c0_i32 = arith.constant 0 : i32
    %c0_i32_0 = arith.constant 0 : i32
    %c0_i32_1 = arith.constant 0 : i32
    return %c0_i32, %c0_i32_0 : i32, i32
  }
  func.func @transform_9(%arg0: i32) -> (i32, i32) {
    %c0_i32 = arith.constant 0 : i32
    %c0_i32_0 = arith.constant 0 : i32
    %c0_i32_1 = arith.constant 0 : i32
    return %c0_i32, %c0_i32_0 : i32, i32
  }
  func.func @transform_10(%arg0: i32) -> (i32, i32) {
    %c0_i32 = arith.constant 0 : i32
    %c0_i32_0 = arith.constant 0 : i32
    %c0_i32_1 = arith.constant 0 : i32
    return %c0_i32, %c0_i32_0 : i32, i32
  }
  func.func @transform_11(%arg0: i32) -> (i32, i32) {
    %c0_i32 = arith.constant 0 : i32
    %c0_i32_0 = arith.constant 0 : i32
    return %arg0, %c0_i32 : i32, i32
  }
}

</mosaic_0001>

<bundles_post_ra>
// kernel: tpu_custom_call.1
= control target key start
LH: loop header
LB: loop body
LE: loop exit
PB: predicated region body
PF: predicated region fallthrough
CT: control target
= control target key end

     0   :  { %16 = vsyncpa [#allocation3], 0  ;;  %s2129_s0 = inlined_call_operand.hbm [shape: bf16[128,128], index: 0, kind: input, shape index: {}]   ;;  %s2130_s1 = inlined_call_operand.hbm [shape: bf16[128,128], index: 1, kind: input, shape index: {}]   ;;  %s2131_s2 = inlined_call_operand.vmem [shape: f32[1,128], index: 2, kind: input, shape index: {}]   ;;  %s2132_s3 = inlined_call_operand.hbm [shape: bf16[128,128], index: 3, kind: input, shape index: {}]   ;;  %s2133_s4 = inlined_call_operand.vmem [shape: f32[1,128], index: 4, kind: input, shape index: {}]   ;;  %s2134_s5 = inlined_call_operand.hbm [shape: bf16[128,128], index: 5, kind: input, shape index: {}]   ;;  %s2135_s6 = inlined_call_operand.vmem [shape: f32[1,128], index: 6, kind: input, shape index: {}]   ;;  %s2136_s7 = inlined_call_operand.hbm [shape: bf16[128,128], index: 7, kind: input, shape index: {}]   ;;  %s2137_s8 = inlined_call_operand.vmem [shape: f32[1,128], index: 8, kind: input, shape index: {}]   ;;  %s2138_s9 = inlined_call_operand.hbm [shape: bf16[128,128], index: 9, kind: input, shape index: {}]   ;;  %s2139_s10 = inlined_call_operand.vmem [shape: f32[1,128], index: 10, kind: input, shape index: {}]   ;;  %s2140_s11 = inlined_call_operand.hbm [shape: f32[128,128], index: 11, kind: output, shape index: {}]  }
   0x1   :  { %17 = vsyncpa [#allocation6], 0 }
   0x2   :  { %18 = vsyncpa [#allocation9], 0 }
   0x3   :  { %19 = vsyncpa [#allocation12], 0 }
   0x4   :  { %20 = vsyncpa [#allocation4], 0  ;;  %s1866_s17 = smov [#allocation5]   ;;  %s1867_s19 = smov [#allocation8]  }
   0x5   :  { %s38_s18 = sshll.u32 %s1866_s17, 4  ;;  %s66_s20 = sshll.u32 %s1867_s19, 4  ;;  %s39_s18 = int_to_ptr.vmem [resolvable:$true] %s38_s18  ;;  %s1937_s20 = int_to_ptr.vmem [resolvable:$true] %s66_s20 }
   0x6   :  { %s1702_s23 = scalar_lea.hbm %s2130_s1, 1024 }
   0x7   :  { %p1703_p0 = scmp.ne.s32.totalorder %s2130_s1, %s1702_s23  ;;  %p1706_p1 = scmp.lt.u32.totalorder %s1702_s23, %s2130_s1 }
   0x9   :  { %p1708_p2 = pnand %p1706_p1, %p1703_p0 }
   0xb   :  { %1711 = shalt.err (!%p1708_p2)
}
   0xc   :  { %s1712_s28 = scalar_lea.vmem %s39_s18, 1024  ;;  %p1717_p4 = scmp.lt.s32.totalorder %s39_s18, %s39_s18 }
   0xd   :  { %p1713_p3 = scmp.ne.s32.totalorder %s39_s18, %s1712_s28  ;;  %p1718_p5 = scmp.lt.s32.totalorder %s1712_s28, %s1712_s28 }
   0xf   :  { %p1719_p6 = por %p1718_p5, %p1717_p4 }
  0x11   :  { %p1720_p7 = pnand %p1719_p6, %p1713_p3 }
  0x13   :  { %1723 = shalt.err (!%p1720_p7)
}
  0x14   :  { %s1868_s29 = smov 64   ;;  %s1869_s30 = smov 4  }
  0x15   :  { %44 = dma.hbm_to_vmem [thread:$0]  %s2130_s1, 1024, %s39_s18, [#allocation6], %s1868_s29, %s1868_s29, %s1869_s30  }
  0x16   :  { %s1724_s16 = scalar_lea.hbm %s2134_s5, 1024 }
  0x17   :  { %p1725_p8 = scmp.ne.s32.totalorder %s2134_s5, %s1724_s16  ;;  %p1728_p9 = scmp.lt.u32.totalorder %s1724_s16, %s2134_s5 }
  0x19   :  { %p1730_p10 = pnand %p1728_p9, %p1725_p8 }
  0x1b   :  { %1733 = shalt.err (!%p1730_p10)
}
  0x1c   :  { %s1734_s23 = scalar_lea.vmem %s1937_s20, 1024  ;;  %p1739_p12 = scmp.lt.s32.totalorder %s1937_s20, %s1937_s20 }
  0x1d   :  { %p1735_p11 = scmp.ne.s32.totalorder %s1937_s20, %s1734_s23  ;;  %p1740_p13 = scmp.lt.s32.totalorder %s1734_s23, %s1734_s23 }
  0x1f   :  { %p1741_p0 = por %p1740_p13, %p1739_p12 }
  0x21   :  { %p1742_p1 = pnand %p1741_p0, %p1735_p11 }
  0x23   :  { %1745 = shalt.err (!%p1742_p1)
}
  0x24   :  { %72 = dma.hbm_to_vmem [thread:$0]  %s2134_s5, 1024, %s1937_s20, [#allocation9], %s1868_s29, %s1868_s29, %s1869_s30  }
  0x25   :  { %s1870_s24 = smov [#allocation2]   ;;  %s1871_s26 = smov [#allocation7]  }
  0x26   :  { %s26_s25 = sshll.u32 %s1870_s24, 4  ;;  %s52_s27 = sshll.u32 %s1871_s26, 4  ;;  %s27_s25 = int_to_ptr.vmem [resolvable:$true] %s26_s25  ;;  %s1974_s27 = int_to_ptr.vmem [resolvable:$true] %s52_s27 }
  0x27   :  { %s1746_s13 = scalar_lea.hbm %s2129_s0, 1024 }
  0x28   :  { %p1747_p2 = scmp.ne.s32.totalorder %s2129_s0, %s1746_s13  ;;  %p1750_p3 = scmp.lt.u32.totalorder %s1746_s13, %s2129_s0 }
  0x2a   :  { %p1752_p4 = pnand %p1750_p3, %p1747_p2 }
  0x2c   :  { %1755 = shalt.err (!%p1752_p4)
}
  0x2d   :  { %s1756_s5 = scalar_lea.vmem %s27_s25, 1024  ;;  %p1761_p6 = scmp.lt.s32.totalorder %s27_s25, %s27_s25 }
  0x2e   :  { %p1757_p5 = scmp.ne.s32.totalorder %s27_s25, %s1756_s5  ;;  %p1762_p7 = scmp.lt.s32.totalorder %s1756_s5, %s1756_s5 }
  0x30   :  { %p1763_p8 = por %p1762_p7, %p1761_p6 }
  0x32   :  { %p1764_p9 = pnand %p1763_p8, %p1757_p5 }
  0x34   :  { %1767 = shalt.err (!%p1764_p9)
}
  0x35   :  { %32 = dma.hbm_to_vmem [thread:$0]  %s2129_s0, 1024, %s27_s25, [#allocation3], %s1868_s29, %s1868_s29, %s1869_s30  }
  0x36   :  { %s1768_s23 = scalar_lea.hbm %s2132_s3, 1024 }
  0x37   :  { %p1769_p10 = scmp.ne.s32.totalorder %s2132_s3, %s1768_s23  ;;  %p1772_p11 = scmp.lt.u32.totalorder %s1768_s23, %s2132_s3 }
  0x39   :  { %p1774_p12 = pnand %p1772_p11, %p1769_p10 }
  0x3b   :  { %1777 = shalt.err (!%p1774_p12)
}
  0x3c   :  { %s1778_s28 = scalar_lea.vmem %s1974_s27, 1024  ;;  %p1783_p0 = scmp.lt.s32.totalorder %s1974_s27, %s1974_s27 }
  0x3d   :  { %p1779_p13 = scmp.ne.s32.totalorder %s1974_s27, %s1778_s28  ;;  %p1784_p1 = scmp.lt.s32.totalorder %s1778_s28, %s1778_s28 }
  0x3f   :  { %p1785_p2 = por %p1784_p1, %p1783_p0 }
  0x41   :  { %p1786_p3 = pnand %p1785_p2, %p1779_p13 }
  0x43   :  { %1789 = shalt.err (!%p1786_p3)
}
  0x44   :  { %58 = dma.hbm_to_vmem [thread:$0]  %s2132_s3, 1024, %s1974_s27, [#allocation6], %s1868_s29, %s1868_s29, %s1869_s30  }
  0x45   :  { %s1872_s12 = smov [#allocation10]   ;;  %s1873_s14 = smov [#allocation11]  }
  0x46   :  { %s80_s13 = sshll.u32 %s1872_s12, 4  ;;  %s94_s15 = sshll.u32 %s1873_s14, 4  ;;  %s81_s13 = int_to_ptr.vmem [resolvable:$true] %s80_s13  ;;  %s2011_s15 = int_to_ptr.vmem [resolvable:$true] %s94_s15 }
  0x47   :  { %s1790_s5 = scalar_lea.hbm %s2136_s7, 1024 }
  0x48   :  { %p1791_p4 = scmp.ne.s32.totalorder %s2136_s7, %s1790_s5  ;;  %p1794_p5 = scmp.lt.u32.totalorder %s1790_s5, %s2136_s7 }
  0x4a   :  { %p1796_p6 = pnand %p1794_p5, %p1791_p4 }
  0x4c   :  { %1799 = shalt.err (!%p1796_p6)
}
  0x4d   :  { %s1800_s3 = scalar_lea.vmem %s81_s13, 1024  ;;  %p1805_p8 = scmp.lt.s32.totalorder %s81_s13, %s81_s13 }
  0x4e   :  { %p1801_p7 = scmp.ne.s32.totalorder %s81_s13, %s1800_s3  ;;  %p1806_p9 = scmp.lt.s32.totalorder %s1800_s3, %s1800_s3 }
  0x50   :  { %p1807_p10 = por %p1806_p9, %p1805_p8 }
  0x52   :  { %p1808_p11 = pnand %p1807_p10, %p1801_p7 }
  0x54   :  { %1811 = shalt.err (!%p1808_p11)
}
  0x55   :  { %86 = dma.hbm_to_vmem [thread:$0]  %s2136_s7, 1024, %s81_s13, [#allocation9], %s1868_s29, %s1868_s29, %s1869_s30  }
  0x56   :  { %s1812_s24 = scalar_lea.hbm %s2138_s9, 1024 }
  0x57   :  { %p1813_p12 = scmp.ne.s32.totalorder %s2138_s9, %s1812_s24  ;;  %p1816_p13 = scmp.lt.u32.totalorder %s1812_s24, %s2138_s9 }
  0x59   :  { %p1818_p0 = pnand %p1816_p13, %p1813_p12 }
  0x5b   :  { %1821 = shalt.err (!%p1818_p0)
}
  0x5c   :  { %s1822_s12 = scalar_lea.vmem %s2011_s15, 1024  ;;  %p1827_p2 = scmp.lt.s32.totalorder %s2011_s15, %s2011_s15 }
  0x5d   :  { %p1823_p1 = scmp.ne.s32.totalorder %s2011_s15, %s1822_s12  ;;  %p1828_p3 = scmp.lt.s32.totalorder %s1822_s12, %s1822_s12 }
  0x5f   :  { %p1829_p4 = por %p1828_p3, %p1827_p2 }
  0x61   :  { %p1830_p5 = pnand %p1829_p4, %p1823_p1 }
  0x63   :  { %1833 = shalt.err (!%p1830_p5)
}
  0x64   :  { %100 = dma.hbm_to_vmem [thread:$0]  %s2138_s9, 1024, %s2011_s15, [#allocation12], %s1868_s29, %s1868_s29, %s1869_s30  }
  0x65   :  { %1856 = dma.done.wait [#allocation3], 1024  }
  0x66   :  { %1857 = vsyncadd [#allocation3], 4294966272 }
  0x67   :  { %1858 = dma.done.wait [#allocation6], 2048  }
  0x68   :  { %1859 = vsyncadd [#allocation6], 4294965248 }
  0x69   :  { %1860 = dma.done.wait [#allocation9], 2048  }
  0x6a   :  { %1861 = vsyncadd [#allocation9], 4294965248 }
  0x6b   :  { %1862 = dma.done.wait [#allocation12], 1024  }
  0x6c   :  { %1863 = vsyncadd [#allocation12], 4294966272  ;;  %v1590_v0 = vld [vmem:[#allocation5] sm:$0xff]   ;;  %v1591_v1 = vld [vmem:[#allocation5 + $0x8] sm:$0xff]  }
  0x6d   :  { %1403 = vmatprep.subr.bf16.mxu0 %v1590_v0  ;;  %v1592_v2 = vld [vmem:[#allocation5 + $0x10] sm:$0xff]   ;;  %v1593_v3 = vld [vmem:[#allocation5 + $0x18] sm:$0xff]   ;;  %v1598_v4 = vld [vmem:[#allocation2] sm:$0xff]  }
  0x6e   :  { %1404 = vmatpush3.bf16.msra.mxu0 %v1590_v0  ;;  %1419 = vmatprep.mubr.bf16.mxu0 %v1598_v4  ;;  %v1594_v5 = vld [vmem:[#allocation5 + $0x20] sm:$0xff]   ;;  %v1595_v6 = vld [vmem:[#allocation5 + $0x28] sm:$0xff]   ;;  %v1596_v9 = vld [vmem:[#allocation5 + $0x30] sm:$0xff]  }
  0x6f   :  { %1405 = vmatprep.subr.bf16.mxu0 %v1591_v1  ;;  %v1606_v7 = vld [vmem:[#allocation7] sm:$0xff]   ;;  %v1607_v8 = vld [vmem:[#allocation7 + $0x8] sm:$0xff]   ;;  %v1608_v10 = vld [vmem:[#allocation7 + $0x10] sm:$0xff]  }
  0x70   :  { %1435 = vmatprep.subr.bf16.mxu1 %v1606_v7  ;;  %v1597_v11 = vld [vmem:[#allocation5 + $0x38] sm:$0xff]   ;;  %v1610_v13 = vld [vmem:[#allocation7 + $0x20] sm:$0xff]   ;;  %v1599_v14 = vld [vmem:[#allocation2 + $0x8] sm:$0xff]  }
  0x71   :  { %1436 = vmatpush3.bf16.msra.mxu1 %v1606_v7  ;;  %v1609_v12 = vld [vmem:[#allocation7 + $0x18] sm:$0xff]   ;;  %v1600_v15 = vld [vmem:[#allocation2 + $0x10] sm:$0xff]   ;;  %v1611_v16 = vld [vmem:[#allocation7 + $0x28] sm:$0xff]  }
  0x72   :  { %1406 = vmatpush3.bf16.msra.mxu0 %v1591_v1  ;;  %1437 = vmatprep.subr.bf16.mxu1 %v1607_v8  ;;  %v1601_v17 = vld [vmem:[#allocation2 + $0x18] sm:$0xff]   ;;  %v1602_v18 = vld [vmem:[#allocation2 + $0x20] sm:$0xff]   ;;  %v1603_v19 = vld [vmem:[#allocation2 + $0x28] sm:$0xff]  }
  0x73   :  { %1407 = vmatprep.subr.bf16.mxu0 %v1592_v2  ;;  %v1604_v20 = vld [vmem:[#allocation2 + $0x30] sm:$0xff]   ;;  %v1605_v21 = vld [vmem:[#allocation2 + $0x38] sm:$0xff]   ;;  %v1614_v24 = vld [vmem:[#allocation8] sm:$0xff]  }
  0x74   :  { %v1612_v22 = vld [vmem:[#allocation7 + $0x30] sm:$0xff]   ;;  %v1613_v23 = vld [vmem:[#allocation7 + $0x38] sm:$0xff]   ;;  %v1615_v25 = vld [vmem:[#allocation8 + $0x8] sm:$0xff]  }
  0x75   :  { %1438 = vmatpush3.bf16.msra.mxu1 %v1607_v8  ;;  %v1616_v26 = vld [vmem:[#allocation8 + $0x10] sm:$0xff]   ;;  %v1617_v27 = vld [vmem:[#allocation8 + $0x18] sm:$0xff]   ;;  %v1618_v28 = vld [vmem:[#allocation8 + $0x20] sm:$0xff]  }
  0x76   :  { %1408 = vmatpush3.bf16.msra.mxu0 %v1592_v2  ;;  %1439 = vmatprep.subr.bf16.mxu1 %v1608_v10  ;;  %v1619_v29 = vld [vmem:[#allocation8 + $0x28] sm:$0xff]   ;;  %v1254_v30 = vld [vmem:[%s2131_s2] ss:$0 sm:$0xff] }
  0x77   :  { %1409 = vmatprep.subr.bf16.mxu0 %v1593_v3 }
  0x79   :  { %1440 = vmatpush3.bf16.msra.mxu1 %v1608_v10 }
  0x7a   :  { %1410 = vmatpush3.bf16.msra.mxu0 %v1593_v3  ;;  %1441 = vmatprep.subr.bf16.mxu1 %v1609_v12 }
  0x7b   :  { %1411 = vmatprep.subr.bf16.mxu0 %v1594_v5 }
  0x7d   :  { %1442 = vmatpush3.bf16.msra.mxu1 %v1609_v12 }
  0x7e   :  { %1412 = vmatpush3.bf16.msra.mxu0 %v1594_v5  ;;  %1443 = vmatprep.subr.bf16.mxu1 %v1610_v13 }
  0x7f   :  { %1413 = vmatprep.subr.bf16.mxu0 %v1595_v6 }
  0x81   :  { %1444 = vmatpush3.bf16.msra.mxu1 %v1610_v13 }
  0x82   :  { %1414 = vmatpush3.bf16.msra.mxu0 %v1595_v6  ;;  %1445 = vmatprep.subr.bf16.mxu1 %v1611_v16 }
  0x83   :  { %1415 = vmatprep.subr.bf16.mxu0 %v1596_v9 }
  0x85   :  { %1446 = vmatpush3.bf16.msra.mxu1 %v1611_v16 }
  0x86   :  { %1416 = vmatpush3.bf16.msra.mxu0 %v1596_v9  ;;  %1447 = vmatprep.subr.bf16.mxu1 %v1612_v22 }
  0x87   :  { %1417 = vmatprep.subr.bf16.mxu0 %v1597_v11 }
  0x89   :  { %1448 = vmatpush3.bf16.msra.mxu1 %v1612_v22 }
  0x8a   :  { %1418 = vmatpush3.bf16.msra.mxu0 %v1597_v11  ;;  %1449 = vmatprep.subr.bf16.mxu1 %v1613_v23 }
  0x8b   :  { %1467 = vmatprep.subr.bf16.mxu0 %v1614_v24 }
  0x8d   :  { %1420 = vmatmul.mubr.bf16.vlgmr.msra.gmra.mrb[0].mxu0 %v1599_v14  ;;  %1450 = vmatpush3.bf16.msra.mxu1 %v1613_v23  ;;  %v1620_v23 = vld [vmem:[#allocation8 + $0x30] sm:$0xff]  }
  0x8e   :  { %1423 = vmatprep.mubr.bf16.mxu0 %v1600_v15  ;;  %1468 = vmatpush3.bf16.msra.mxu0 %v1614_v24  ;;  %v1621_v24 = vld [vmem:[#allocation8 + $0x38] sm:$0xff]  }
  0x8f   :  { %1469 = vmatprep.subr.bf16.mxu0 %v1615_v25 }
  0x92   :  { %1470 = vmatpush3.bf16.msra.mxu0 %v1615_v25  ;;  %v1622_v25 = vld [vmem:[#allocation10] sm:$0xff]  }
  0x93   :  { %1471 = vmatprep.subr.bf16.mxu0 %v1616_v26  ;;  %1499 = vmatprep.subr.bf16.mxu1 %v1622_v25 }
  0x95   :  { %1424 = vmatmul.mubr.bf16.gmra.mrb[4].mxu0 %v1601_v17 }
  0x96   :  { %1427 = vmatprep.mubr.bf16.mxu0 %v1602_v18  ;;  %1472 = vmatpush3.bf16.msra.mxu0 %v1616_v26  ;;  %v1623_v26 = vld [vmem:[#allocation10 + $0x8] sm:$0xff]  }
  0x97   :  { %1473 = vmatprep.subr.bf16.mxu0 %v1617_v27 }
  0x9a   :  { %1474 = vmatpush3.bf16.msra.mxu0 %v1617_v27  ;;  %v1624_v27 = vld [vmem:[#allocation10 + $0x10] sm:$0xff]  }
  0x9b   :  { %1475 = vmatprep.subr.bf16.mxu0 %v1618_v28 }
  0x9d   :  { %1428 = vmatmul.mubr.bf16.gmra.mrb[8].mxu0 %v1603_v19 }
  0x9e   :  { %1431 = vmatprep.mubr.bf16.mxu0 %v1604_v20  ;;  %1476 = vmatpush3.bf16.msra.mxu0 %v1618_v28  ;;  %v1625_v28 = vld [vmem:[#allocation10 + $0x18] sm:$0xff]  }
  0x9f   :  { %1477 = vmatprep.subr.bf16.mxu0 %v1619_v29 }
  0xa2   :  { %1478 = vmatpush3.bf16.msra.mxu0 %v1619_v29  ;;  %v1626_v29 = vld [vmem:[#allocation10 + $0x20] sm:$0xff]  }
  0xa3   :  { %1479 = vmatprep.subr.bf16.mxu0 %v1620_v23 }
  0xa5   :  { %1432 = vmatmul.mubr.bf16.gmra.mrb[12].mxu0 %v1605_v21 }
  0xa6   :  { %1480 = vmatpush3.bf16.msra.mxu0 %v1620_v23 }
  0xa7   :  { %1481 = vmatprep.subr.bf16.mxu0 %v1621_v24 }
  0xaa   :  { %1482 = vmatpush3.bf16.msra.mxu0 %v1621_v24  ;;  %v1628_v24 = vld [vmem:[#allocation10 + $0x30] sm:$0xff]  }
 0x160   :  { %v1421_v31 = vpop.f32.mrb[0].mxu0 }
 0x161   :  { %v300_v32 = vadd.f32 %v1421_v31, %v1254_v30  ;;  %v291_v33 = vpop.f32.mrb[1].mxu0  ;;  %v1271_v31 = vld [vmem:[%s2133_s4] ss:$0 sm:$0xff] }
 0x162   :  { %v292_v34 = vadd.f32 %v1254_v30, %v291_v33  ;;  %v1422_v35 = vpop.f32.mrb[2].mxu0 }
 0x163   :  { %v303_v36 = vadd.f32 %v1422_v35, %v1254_v30  ;;  %v294_v37 = vpop.f32.mrb[3].mxu0  ;;  %v356_v39 = vmax.f32 %v300_v32, 0.0 }
 0x164   :  { %v295_v38 = vadd.f32 %v1254_v30, %v294_v37  ;;  %v354_v41 = vmax.f32 %v292_v34, 0.0 }
 0x165   :  { %v357_v40 = vmax.f32 %v303_v36, 0.0 }
 0x166   :  { %v355_v42 = vmax.f32 %v295_v38, 0.0 }
 0x167   :  { %v371_v43 = vpack.c.bf16 %v357_v40, %v356_v39 }
 0x168   :  { %v1425_v44 = vpop.f32.mrb[4].mxu0  ;;  %v370_v45 = vpack.c.bf16 %v355_v42, %v354_v41 }
 0x169   :  { %v316_v46 = vadd.f32 %v1425_v44, %v1254_v30  ;;  %v307_v47 = vpop.f32.mrb[5].mxu0 }
 0x16a   :  { %v308_v48 = vadd.f32 %v1254_v30, %v307_v47  ;;  %v1426_v49 = vpop.f32.mrb[6].mxu0  ;;  %1451 = vmatprep.mubr.bf16.mxu1 %v370_v45 }
 0x16b   :  { %v319_v50 = vadd.f32 %v1426_v49, %v1254_v30  ;;  %v310_v51 = vpop.f32.mrb[7].mxu0  ;;  %1452 = vmatmul.mubr.bf16.vlgmr.msra.gmra.mrb[0].mxu1 %v371_v43  ;;  %v360_v53 = vmax.f32 %v316_v46, 0.0 }
 0x16c   :  { %v311_v52 = vadd.f32 %v1254_v30, %v310_v51  ;;  %v358_v55 = vmax.f32 %v308_v48, 0.0  ;;  %1500 = vmatpush3.bf16.msra.mxu1 %v1622_v25  ;;  %v1629_v25 = vld [vmem:[#allocation10 + $0x38] sm:$0xff]  }
 0x16d   :  { %v361_v54 = vmax.f32 %v319_v50, 0.0  ;;  %1501 = vmatprep.subr.bf16.mxu1 %v1623_v26 }
 0x16e   :  { %v359_v56 = vmax.f32 %v311_v52, 0.0 }
 0x16f   :  { %v373_v57 = vpack.c.bf16 %v361_v54, %v360_v53 }
 0x170   :  { %v372_v58 = vpack.c.bf16 %v359_v56, %v358_v55  ;;  %v1429_v59 = vpop.f32.mrb[8].mxu0  ;;  %1502 = vmatpush3.bf16.msra.mxu1 %v1623_v26  ;;  %v1630_v26 = vld [vmem:[#allocation11] sm:$0xff]  }
 0x171   :  { %v332_v60 = vadd.f32 %v1429_v59, %v1254_v30  ;;  %v323_v61 = vpop.f32.mrb[9].mxu0  ;;  %1503 = vmatprep.subr.bf16.mxu1 %v1624_v27  ;;  %1531 = vmatprep.subr.bf16.mxu0 %v1630_v26 }
 0x172   :  { %v324_v62 = vadd.f32 %v1254_v30, %v323_v61  ;;  %v1430_v63 = vpop.f32.mrb[10].mxu0  ;;  %1455 = vmatprep.mubr.bf16.mxu1 %v372_v58 }
 0x173   :  { %v335_v0 = vadd.f32 %v1430_v63, %v1254_v30  ;;  %v326_v1 = vpop.f32.mrb[11].mxu0  ;;  %1456 = vmatmul.mubr.bf16.gmra.mrb[4].mxu1 %v373_v57  ;;  %v364_v3 = vmax.f32 %v332_v60, 0.0 }
 0x174   :  { %v327_v2 = vadd.f32 %v1254_v30, %v326_v1  ;;  %v362_v5 = vmax.f32 %v324_v62, 0.0  ;;  %1504 = vmatpush3.bf16.msra.mxu1 %v1624_v27  ;;  %v1631_v27 = vld [vmem:[#allocation11 + $0x8] sm:$0xff]  }
 0x175   :  { %v365_v4 = vmax.f32 %v335_v0, 0.0  ;;  %1505 = vmatprep.subr.bf16.mxu1 %v1625_v28 }
 0x176   :  { %v363_v6 = vmax.f32 %v327_v2, 0.0 }
 0x177   :  { %v375_v7 = vpack.c.bf16 %v365_v4, %v364_v3 }
 0x178   :  { %v374_v8 = vpack.c.bf16 %v363_v6, %v362_v5  ;;  %v1433_v9 = vpop.f32.mrb[12].mxu0  ;;  %1506 = vmatpush3.bf16.msra.mxu1 %v1625_v28  ;;  %v1632_v28 = vld [vmem:[#allocation11 + $0x10] sm:$0xff]  }
 0x179   :  { %v348_v10 = vadd.f32 %v1433_v9, %v1254_v30  ;;  %v339_v11 = vpop.f32.mrb[13].mxu0  ;;  %1507 = vmatprep.subr.bf16.mxu1 %v1626_v29 }
 0x17a   :  { %v340_v12 = vadd.f32 %v1254_v30, %v339_v11  ;;  %v1434_v13 = vpop.f32.mrb[14].mxu0  ;;  %1459 = vmatprep.mubr.bf16.mxu1 %v374_v8 }
 0x17b   :  { %v351_v14 = vadd.f32 %v1434_v13, %v1254_v30  ;;  %v342_v15 = vpop.f32.mrb[15].mxu0  ;;  %1460 = vmatmul.mubr.bf16.gmra.mrb[8].mxu1 %v375_v7  ;;  %v368_v17 = vmax.f32 %v348_v10, 0.0 }
 0x17c   :  { %v343_v16 = vadd.f32 %v1254_v30, %v342_v15  ;;  %v366_v19 = vmax.f32 %v340_v12, 0.0  ;;  %v1627_v30 = vld [vmem:[#allocation10 + $0x28] sm:$0xff]   ;;  %1508 = vmatpush3.bf16.msra.mxu1 %v1626_v29  ;;  %v2054_v29 = vld [vmem:[#allocation11 + $0x18] sm:$0xff]  }
 0x17d   :  { %v369_v18 = vmax.f32 %v351_v14, 0.0  ;;  %1509 = vmatprep.subr.bf16.mxu1 %v1627_v30 }
 0x17e   :  { %v367_v20 = vmax.f32 %v343_v16, 0.0 }
 0x17f   :  { %v377_v21 = vpack.c.bf16 %v369_v18, %v368_v17 }
 0x180   :  { %v376_v22 = vpack.c.bf16 %v367_v20, %v366_v19  ;;  %1510 = vmatpush3.bf16.msra.mxu1 %v1627_v30  ;;  %v2057_v30 = vld [vmem:[#allocation11 + $0x20] sm:$0xff]  }
 0x181   :  { %1511 = vmatprep.subr.bf16.mxu1 %v1628_v24 }
 0x182   :  { %1463 = vmatprep.mubr.bf16.mxu1 %v376_v22 }
 0x183   :  { %1464 = vmatmul.mubr.bf16.gmra.mrb[12].mxu1 %v377_v21 }
 0x184   :  { %1512 = vmatpush3.bf16.msra.mxu1 %v1628_v24 }
 0x185   :  { %1513 = vmatprep.subr.bf16.mxu1 %v1629_v25 }
 0x188   :  { %1514 = vmatpush3.bf16.msra.mxu1 %v1629_v25  ;;  %v1636_v25 = vld [vmem:[#allocation11 + $0x30] sm:$0xff]  }
 0x189   :  { %1563 = vmatprep.subr.bf16.mxu1 %v1630_v26 }
 0x23e   :  { %v1453_v32 = vpop.f32.mrb[0].mxu1 }
 0x23f   :  { %v492_v33 = vadd.f32 %v1453_v32, %v1271_v31  ;;  %v483_v34 = vpop.f32.mrb[1].mxu1  ;;  %v2069_v32 = vld [vmem:[%s2135_s6] ss:$0 sm:$0xff] }
 0x240   :  { %v484_v35 = vadd.f32 %v1271_v31, %v483_v34  ;;  %v1454_v36 = vpop.f32.mrb[2].mxu1 }
 0x241   :  { %v495_v37 = vadd.f32 %v1454_v36, %v1271_v31  ;;  %v486_v38 = vpop.f32.mrb[3].mxu1  ;;  %v548_v40 = vmax.f32 %v492_v33, 0.0 }
 0x242   :  { %v487_v39 = vadd.f32 %v1271_v31, %v486_v38  ;;  %v546_v42 = vmax.f32 %v484_v35, 0.0 }
 0x243   :  { %v549_v41 = vmax.f32 %v495_v37, 0.0 }
 0x244   :  { %v547_v43 = vmax.f32 %v487_v39, 0.0 }
 0x245   :  { %v563_v44 = vpack.c.bf16 %v549_v41, %v548_v40 }
 0x246   :  { %v562_v45 = vpack.c.bf16 %v547_v43, %v546_v42  ;;  %v1457_v46 = vpop.f32.mrb[4].mxu1 }
 0x247   :  { %v508_v47 = vadd.f32 %v1457_v46, %v1271_v31  ;;  %v499_v48 = vpop.f32.mrb[5].mxu1 }
 0x248   :  { %v500_v49 = vadd.f32 %v1271_v31, %v499_v48  ;;  %v1458_v50 = vpop.f32.mrb[6].mxu1  ;;  %1483 = vmatprep.mubr.bf16.mxu0 %v562_v45 }
 0x249   :  { %v511_v51 = vadd.f32 %v1458_v50, %v1271_v31  ;;  %v502_v52 = vpop.f32.mrb[7].mxu1  ;;  %1484 = vmatmul.mubr.bf16.vlgmr.msra.gmra.mrb[16].mxu0 %v563_v44  ;;  %v552_v54 = vmax.f32 %v508_v47, 0.0 }
 0x24a   :  { %v503_v53 = vadd.f32 %v1271_v31, %v502_v52  ;;  %v550_v56 = vmax.f32 %v500_v49, 0.0  ;;  %1532 = vmatpush3.bf16.msra.mxu0 %v1630_v26 }
 0x24b   :  { %v553_v55 = vmax.f32 %v511_v51, 0.0  ;;  %1533 = vmatprep.subr.bf16.mxu0 %v1631_v27 }
 0x24c   :  { %v551_v57 = vmax.f32 %v503_v53, 0.0 }
 0x24d   :  { %v565_v58 = vpack.c.bf16 %v553_v55, %v552_v54 }
 0x24e   :  { %v564_v59 = vpack.c.bf16 %v551_v57, %v550_v56  ;;  %v1461_v60 = vpop.f32.mrb[8].mxu1  ;;  %1534 = vmatpush3.bf16.msra.mxu0 %v1631_v27 }
 0x24f   :  { %v524_v61 = vadd.f32 %v1461_v60, %v1271_v31  ;;  %v515_v62 = vpop.f32.mrb[9].mxu1  ;;  %1535 = vmatprep.subr.bf16.mxu0 %v1632_v28 }
 0x250   :  { %v516_v63 = vadd.f32 %v1271_v31, %v515_v62  ;;  %v1462_v0 = vpop.f32.mrb[10].mxu1  ;;  %1487 = vmatprep.mubr.bf16.mxu0 %v564_v59 }
 0x251   :  { %v527_v1 = vadd.f32 %v1462_v0, %v1271_v31  ;;  %v518_v2 = vpop.f32.mrb[11].mxu1  ;;  %1488 = vmatmul.mubr.bf16.gmra.mrb[20].mxu0 %v565_v58  ;;  %v556_v4 = vmax.f32 %v524_v61, 0.0 }
 0x252   :  { %v519_v3 = vadd.f32 %v1271_v31, %v518_v2  ;;  %v554_v6 = vmax.f32 %v516_v63, 0.0  ;;  %1536 = vmatpush3.bf16.msra.mxu0 %v1632_v28 }
 0x253   :  { %v557_v5 = vmax.f32 %v527_v1, 0.0  ;;  %1537 = vmatprep.subr.bf16.mxu0 %v2054_v29 }
 0x254   :  { %v555_v7 = vmax.f32 %v519_v3, 0.0 }
 0x255   :  { %v567_v8 = vpack.c.bf16 %v557_v5, %v556_v4 }
 0x256   :  { %v566_v9 = vpack.c.bf16 %v555_v7, %v554_v6  ;;  %v1465_v10 = vpop.f32.mrb[12].mxu1  ;;  %1538 = vmatpush3.bf16.msra.mxu0 %v2054_v29 }
 0x257   :  { %v540_v11 = vadd.f32 %v1465_v10, %v1271_v31  ;;  %v531_v12 = vpop.f32.mrb[13].mxu1  ;;  %1539 = vmatprep.subr.bf16.mxu0 %v2057_v30 }
 0x258   :  { %v532_v13 = vadd.f32 %v1271_v31, %v531_v12  ;;  %v1466_v14 = vpop.f32.mrb[14].mxu1  ;;  %1491 = vmatprep.mubr.bf16.mxu0 %v566_v9 }
 0x259   :  { %v543_v15 = vadd.f32 %v1466_v14, %v1271_v31  ;;  %v534_v16 = vpop.f32.mrb[15].mxu1  ;;  %1492 = vmatmul.mubr.bf16.gmra.mrb[24].mxu0 %v567_v8  ;;  %v560_v18 = vmax.f32 %v540_v11, 0.0 }
 0x25a   :  { %v535_v17 = vadd.f32 %v1271_v31, %v534_v16  ;;  %v558_v20 = vmax.f32 %v532_v13, 0.0  ;;  %v2061_v31 = vld [vmem:[#allocation11 + $0x28] sm:$0xff]   ;;  %1540 = vmatpush3.bf16.msra.mxu0 %v2057_v30 }
 0x25b   :  { %v561_v19 = vmax.f32 %v543_v15, 0.0  ;;  %1541 = vmatprep.subr.bf16.mxu0 %v2061_v31 }
 0x25c   :  { %v559_v21 = vmax.f32 %v535_v17, 0.0 }
 0x25d   :  { %v569_v22 = vpack.c.bf16 %v561_v19, %v560_v18 }
 0x25e   :  { %v568_v23 = vpack.c.bf16 %v559_v21, %v558_v20  ;;  %1542 = vmatpush3.bf16.msra.mxu0 %v2061_v31 }
 0x25f   :  { %1543 = vmatprep.subr.bf16.mxu0 %v1636_v25 }
 0x260   :  { %1495 = vmatprep.mubr.bf16.mxu0 %v568_v23 }
 0x261   :  { %1496 = vmatmul.mubr.bf16.gmra.mrb[28].mxu0 %v569_v22 }
 0x262   :  { %1544 = vmatpush3.bf16.msra.mxu0 %v1636_v25 }
 0x31c   :  { %v1485_v33 = vpop.f32.mrb[16].mxu0 }
 0x31d   :  { %v684_v34 = vadd.f32 %v1485_v33, %v2069_v32  ;;  %v675_v35 = vpop.f32.mrb[17].mxu0 }
 0x31e   :  { %v676_v36 = vadd.f32 %v2069_v32, %v675_v35  ;;  %v1486_v37 = vpop.f32.mrb[18].mxu0 }
 0x31f   :  { %v687_v38 = vadd.f32 %v1486_v37, %v2069_v32  ;;  %v678_v39 = vpop.f32.mrb[19].mxu0  ;;  %v740_v41 = vmax.f32 %v684_v34, 0.0 }
 0x320   :  { %v679_v40 = vadd.f32 %v2069_v32, %v678_v39  ;;  %v738_v43 = vmax.f32 %v676_v36, 0.0 }
 0x321   :  { %v741_v42 = vmax.f32 %v687_v38, 0.0 }
 0x322   :  { %v739_v44 = vmax.f32 %v679_v40, 0.0 }
 0x323   :  { %v755_v45 = vpack.c.bf16 %v741_v42, %v740_v41 }
 0x324   :  { %v754_v46 = vpack.c.bf16 %v739_v44, %v738_v43  ;;  %v1489_v47 = vpop.f32.mrb[20].mxu0 }
 0x325   :  { %v700_v48 = vadd.f32 %v1489_v47, %v2069_v32  ;;  %v691_v49 = vpop.f32.mrb[21].mxu0 }
 0x326   :  { %v692_v50 = vadd.f32 %v2069_v32, %v691_v49  ;;  %v1490_v51 = vpop.f32.mrb[22].mxu0  ;;  %1515 = vmatprep.mubr.bf16.mxu1 %v754_v46 }
 0x327   :  { %v703_v52 = vadd.f32 %v1490_v51, %v2069_v32  ;;  %v694_v53 = vpop.f32.mrb[23].mxu0  ;;  %1516 = vmatmul.mubr.bf16.vlgmr.msra.gmra.mrb[16].mxu1 %v755_v45  ;;  %v744_v55 = vmax.f32 %v700_v48, 0.0 }
 0x328   :  { %v695_v54 = vadd.f32 %v2069_v32, %v694_v53  ;;  %1571 = vmatpush3.bf16.msra.mxu1 %v1630_v26  ;;  %v742_v57 = vmax.f32 %v692_v50, 0.0  ;;  %v1637_v26 = vld [vmem:[#allocation11 + $0x38] sm:$0xff]  }
 0x329   :  { %v745_v56 = vmax.f32 %v703_v52, 0.0  ;;  %1564 = vmatprep.subr.bf16.mxu1 %v1631_v27  ;;  %1545 = vmatprep.subr.bf16.mxu0 %v1637_v26 }
 0x32a   :  { %v743_v58 = vmax.f32 %v695_v54, 0.0  ;;  %1546 = vmatpush3.bf16.msra.mxu0 %v1637_v26 }
 0x32b   :  { %v757_v59 = vpack.c.bf16 %v745_v56, %v744_v55 }
 0x32c   :  { %v756_v60 = vpack.c.bf16 %v743_v58, %v742_v57  ;;  %v1493_v61 = vpop.f32.mrb[24].mxu0  ;;  %1572 = vmatpush3.bf16.msra.mxu1 %v1631_v27  ;;  %v1289_v27 = vld [vmem:[%s2137_s8] ss:$0 sm:$0xff] }
 0x32d   :  { %v716_v62 = vadd.f32 %v1493_v61, %v2069_v32  ;;  %v707_v63 = vpop.f32.mrb[25].mxu0  ;;  %1565 = vmatprep.subr.bf16.mxu1 %v1632_v28 }
 0x32e   :  { %v708_v0 = vadd.f32 %v2069_v32, %v707_v63  ;;  %v1494_v1 = vpop.f32.mrb[26].mxu0  ;;  %1519 = vmatprep.mubr.bf16.mxu1 %v756_v60 }
 0x32f   :  { %v719_v2 = vadd.f32 %v1494_v1, %v2069_v32  ;;  %v710_v3 = vpop.f32.mrb[27].mxu0  ;;  %1520 = vmatmul.mubr.bf16.gmra.mrb[20].mxu1 %v757_v59  ;;  %v748_v5 = vmax.f32 %v716_v62, 0.0 }
 0x330   :  { %v711_v4 = vadd.f32 %v2069_v32, %v710_v3  ;;  %1573 = vmatpush3.bf16.msra.mxu1 %v1632_v28  ;;  %v746_v7 = vmax.f32 %v708_v0, 0.0 }
 0x331   :  { %v749_v6 = vmax.f32 %v719_v2, 0.0  ;;  %1566 = vmatprep.subr.bf16.mxu1 %v2054_v29 }
 0x332   :  { %v747_v8 = vmax.f32 %v711_v4, 0.0 }
 0x333   :  { %v759_v9 = vpack.c.bf16 %v749_v6, %v748_v5 }
 0x334   :  { %v758_v10 = vpack.c.bf16 %v747_v8, %v746_v7  ;;  %v1497_v11 = vpop.f32.mrb[28].mxu0  ;;  %1574 = vmatpush3.bf16.msra.mxu1 %v2054_v29 }
 0x335   :  { %v732_v12 = vadd.f32 %v1497_v11, %v2069_v32  ;;  %v723_v13 = vpop.f32.mrb[29].mxu0  ;;  %1567 = vmatprep.subr.bf16.mxu1 %v2057_v30 }
 0x336   :  { %v724_v14 = vadd.f32 %v2069_v32, %v723_v13  ;;  %v1498_v15 = vpop.f32.mrb[30].mxu0  ;;  %1523 = vmatprep.mubr.bf16.mxu1 %v758_v10 }
 0x337   :  { %v735_v16 = vadd.f32 %v1498_v15, %v2069_v32  ;;  %v726_v17 = vpop.f32.mrb[31].mxu0  ;;  %1524 = vmatmul.mubr.bf16.gmra.mrb[24].mxu1 %v759_v9  ;;  %v752_v19 = vmax.f32 %v732_v12, 0.0 }
 0x338   :  { %v727_v18 = vadd.f32 %v2069_v32, %v726_v17  ;;  %1575 = vmatpush3.bf16.msra.mxu1 %v2057_v30  ;;  %v750_v21 = vmax.f32 %v724_v14, 0.0 }
 0x339   :  { %v753_v20 = vmax.f32 %v735_v16, 0.0  ;;  %1568 = vmatprep.subr.bf16.mxu1 %v2061_v31 }
 0x33a   :  { %v751_v22 = vmax.f32 %v727_v18, 0.0 }
 0x33b   :  { %v761_v23 = vpack.c.bf16 %v753_v20, %v752_v19  ;;  %v2099_v20 = vld [vmem:[%s2139_s10] ss:$0 sm:$0xff]  ;;  %s1874_s10 = smov [#allocation13]  }
 0x33c   :  { %v760_v24 = vpack.c.bf16 %v751_v22, %v750_v21  ;;  %1576 = vmatpush3.bf16.msra.mxu1 %v2061_v31  ;;  %s1239_s17 = sshll.u32 %s1874_s10, 4  ;;  %s1240_s17 = int_to_ptr.vmem [resolvable:$true] %s1239_s17 }
 0x33d   :  { %1569 = vmatprep.subr.bf16.mxu1 %v1636_v25  ;;  %s1834_s5 = scalar_lea.vmem %s1240_s17, 2048  ;;  %p1839_p7 = scmp.lt.s32.totalorder %s1240_s17, %s1240_s17 }
 0x33e   :  { %1527 = vmatprep.mubr.bf16.mxu1 %v760_v24  ;;  %p1835_p6 = scmp.ne.s32.totalorder %s1240_s17, %s1834_s5  ;;  %p1840_p8 = scmp.lt.s32.totalorder %s1834_s5, %s1834_s5 }
 0x33f   :  { %1528 = vmatmul.mubr.bf16.gmra.mrb[28].mxu1 %v761_v23 }
 0x340   :  { %1577 = vmatpush3.bf16.msra.mxu1 %v1636_v25  ;;  %p1841_p9 = por %p1840_p8, %p1839_p7 }
 0x341   :  { %1570 = vmatprep.subr.bf16.mxu1 %v1637_v26 }
 0x342   :  { %p1842_p10 = pnand %p1841_p9, %p1835_p6 }
 0x344   :  { %1578 = vmatpush3.bf16.msra.mxu1 %v1637_v26 }
 0x3fa   :  { %v1517_v28 = vpop.f32.mrb[16].mxu1 }
 0x3fb   :  { %v876_v29 = vadd.f32 %v1517_v28, %v1289_v27  ;;  %v867_v30 = vpop.f32.mrb[17].mxu1 }
 0x3fc   :  { %v868_v31 = vadd.f32 %v1289_v27, %v867_v30  ;;  %v1518_v32 = vpop.f32.mrb[18].mxu1 }
 0x3fd   :  { %v879_v33 = vadd.f32 %v1518_v32, %v1289_v27  ;;  %v870_v34 = vpop.f32.mrb[19].mxu1  ;;  %v932_v36 = vmax.f32 %v876_v29, 0.0 }
 0x3fe   :  { %v871_v35 = vadd.f32 %v1289_v27, %v870_v34  ;;  %v930_v38 = vmax.f32 %v868_v31, 0.0 }
 0x3ff   :  { %v933_v37 = vmax.f32 %v879_v33, 0.0 }
 0x400   :  { %v931_v39 = vmax.f32 %v871_v35, 0.0 }
 0x401   :  { %v947_v40 = vpack.c.bf16 %v933_v37, %v932_v36 }
 0x402   :  { %v946_v41 = vpack.c.bf16 %v931_v39, %v930_v38  ;;  %v1521_v42 = vpop.f32.mrb[20].mxu1 }
 0x403   :  { %v892_v43 = vadd.f32 %v1521_v42, %v1289_v27  ;;  %v883_v44 = vpop.f32.mrb[21].mxu1 }
 0x404   :  { %v884_v45 = vadd.f32 %v1289_v27, %v883_v44  ;;  %v1522_v46 = vpop.f32.mrb[22].mxu1  ;;  %1547 = vmatprep.mubr.bf16.mxu0 %v946_v41 }
 0x405   :  { %v895_v47 = vadd.f32 %v1522_v46, %v1289_v27  ;;  %v886_v48 = vpop.f32.mrb[23].mxu1  ;;  %1548 = vmatmul.mubr.bf16.vlgmr.msra.gmra.mrb[32].mxu0 %v947_v40  ;;  %v936_v50 = vmax.f32 %v892_v43, 0.0 }
 0x406   :  { %v887_v49 = vadd.f32 %v1289_v27, %v886_v48  ;;  %v934_v52 = vmax.f32 %v884_v45, 0.0 }
 0x407   :  { %v937_v51 = vmax.f32 %v895_v47, 0.0 }
 0x408   :  { %v935_v53 = vmax.f32 %v887_v49, 0.0 }
 0x409   :  { %v949_v54 = vpack.c.bf16 %v937_v51, %v936_v50 }
 0x40a   :  { %v948_v55 = vpack.c.bf16 %v935_v53, %v934_v52  ;;  %v1525_v56 = vpop.f32.mrb[24].mxu1 }
 0x40b   :  { %v908_v57 = vadd.f32 %v1525_v56, %v1289_v27  ;;  %v899_v58 = vpop.f32.mrb[25].mxu1 }
 0x40c   :  { %v900_v59 = vadd.f32 %v1289_v27, %v899_v58  ;;  %v1526_v60 = vpop.f32.mrb[26].mxu1  ;;  %1551 = vmatprep.mubr.bf16.mxu0 %v948_v55 }
 0x40d   :  { %v911_v61 = vadd.f32 %v1526_v60, %v1289_v27  ;;  %v902_v62 = vpop.f32.mrb[27].mxu1  ;;  %1552 = vmatmul.mubr.bf16.gmra.mrb[36].mxu0 %v949_v54  ;;  %v940_v0 = vmax.f32 %v908_v57, 0.0 }
 0x40e   :  { %v903_v63 = vadd.f32 %v1289_v27, %v902_v62  ;;  %v938_v2 = vmax.f32 %v900_v59, 0.0 }
 0x40f   :  { %v941_v1 = vmax.f32 %v911_v61, 0.0 }
 0x410   :  { %v939_v3 = vmax.f32 %v903_v63, 0.0 }
 0x411   :  { %v951_v4 = vpack.c.bf16 %v941_v1, %v940_v0 }
 0x412   :  { %v950_v5 = vpack.c.bf16 %v939_v3, %v938_v2  ;;  %v1529_v6 = vpop.f32.mrb[28].mxu1 }
 0x413   :  { %v924_v7 = vadd.f32 %v1529_v6, %v1289_v27  ;;  %v915_v8 = vpop.f32.mrb[29].mxu1 }
 0x414   :  { %v916_v9 = vadd.f32 %v1289_v27, %v915_v8  ;;  %v1530_v10 = vpop.f32.mrb[30].mxu1  ;;  %1555 = vmatprep.mubr.bf16.mxu1 %v950_v5 }
 0x415   :  { %v927_v11 = vadd.f32 %v1530_v10, %v1289_v27  ;;  %v918_v12 = vpop.f32.mrb[31].mxu1  ;;  %1556 = vmatmul.mubr.bf16.vlgmr.msra.gmra.mrb[32].mxu1 %v951_v4  ;;  %v944_v14 = vmax.f32 %v924_v7, 0.0 }
 0x416   :  { %v919_v13 = vadd.f32 %v1289_v27, %v918_v12  ;;  %v942_v16 = vmax.f32 %v916_v9, 0.0 }
 0x417   :  { %v945_v15 = vmax.f32 %v927_v11, 0.0 }
 0x418   :  { %v943_v17 = vmax.f32 %v919_v13, 0.0 }
 0x419   :  { %v953_v18 = vpack.c.bf16 %v945_v15, %v944_v14 }
 0x41a   :  { %v952_v19 = vpack.c.bf16 %v943_v17, %v942_v16 }
 0x41c   :  { %1559 = vmatprep.mubr.bf16.mxu1 %v952_v19 }
 0x41d   :  { %1560 = vmatmul.mubr.bf16.gmra.mrb[36].mxu1 %v953_v18 }
 0x4d8   :  { %v1549_v21 = vpop.f32.mrb[32].mxu0 }
 0x4d9   :  { %v1068_v22 = vadd.f32 %v1549_v21, %v2099_v20  ;;  %v1059_v23 = vpop.f32.mrb[33].mxu0 }
 0x4da   :  { %v1060_v24 = vadd.f32 %v2099_v20, %v1059_v23  ;;  %v1550_v25 = vpop.f32.mrb[34].mxu0 }
 0x4db   :  { %v1309_v26 = vmul.f32 -1.442695, %v1068_v22  ;;  %v1071_v27 = vadd.f32 %v1550_v25, %v2099_v20  ;;  %v1062_v28 = vpop.f32.mrb[35].mxu0 }
 0x4dc   :  { %v1307_v29 = vmul.f32 -1.442695, %v1060_v24  ;;  %v1063_v30 = vadd.f32 %v2099_v20, %v1062_v28 }
 0x4dd   :  { %1638 = vpow2.f32 %v1309_v26  ;;  %v1310_v31 = vmul.f32 -1.442695, %v1071_v27 }
 0x4de   :  { %1640 = vpow2.f32 %v1307_v29  ;;  %v1308_v32 = vmul.f32 -1.442695, %v1063_v30 }
 0x4df   :  { %1642 = vpow2.f32 %v1310_v31 }
 0x4e0   :  { %1644 = vpow2.f32 %v1308_v32  ;;  %v1553_v33 = vpop.f32.mrb[36].mxu0 }
 0x4e1   :  { %v1084_v34 = vadd.f32 %v1553_v33, %v2099_v20  ;;  %v1075_v35 = vpop.f32.mrb[37].mxu0 }
 0x4e2   :  { %v1076_v36 = vadd.f32 %v2099_v20, %v1075_v35  ;;  %v1554_v37 = vpop.f32.mrb[38].mxu0 }
 0x4e3   :  { %v1313_v38 = vmul.f32 -1.442695, %v1084_v34  ;;  %v1087_v39 = vadd.f32 %v1554_v37, %v2099_v20  ;;  %v1078_v40 = vpop.f32.mrb[39].mxu0 }
 0x4e4   :  { %v1311_v41 = vmul.f32 -1.442695, %v1076_v36  ;;  %v1079_v42 = vadd.f32 %v2099_v20, %v1078_v40 }
 0x4e5   :  { %1646 = vpow2.f32 %v1313_v38  ;;  %v1314_v43 = vmul.f32 -1.442695, %v1087_v39 }
 0x4e6   :  { %1648 = vpow2.f32 %v1311_v41  ;;  %v1312_v44 = vmul.f32 -1.442695, %v1079_v42 }
 0x4e7   :  { %v1639_v45 = vpop.eup %1638  ;;  %1650 = vpow2.f32 %v1314_v43 }
 0x4e8   :  { %v1641_v46 = vpop.eup %1640  ;;  %v1172_v47 = vadd.f32 1.0, %v1639_v45  ;;  %1652 = vpow2.f32 %v1312_v44  ;;  %v1557_v48 = vpop.f32.mrb[32].mxu1 }
 0x4e9   :  { %v1643_v49 = vpop.eup %1642  ;;  %v1170_v50 = vadd.f32 1.0, %v1641_v46  ;;  %v1100_v51 = vadd.f32 %v1557_v48, %v2099_v20  ;;  %v1091_v52 = vpop.f32.mrb[33].mxu1 }
 0x4ea   :  { %v1645_v53 = vpop.eup %1644  ;;  %1654 = vrcp.f32 %v1172_v47  ;;  %v1173_v54 = vadd.f32 1.0, %v1643_v49  ;;  %v1092_v55 = vadd.f32 %v2099_v20, %v1091_v52  ;;  %v1558_v56 = vpop.f32.mrb[34].mxu1 }
 0x4eb   :  { %1656 = vrcp.f32 %v1170_v50  ;;  %v1171_v57 = vadd.f32 1.0, %v1645_v53  ;;  %v1317_v58 = vmul.f32 -1.442695, %v1100_v51  ;;  %v1103_v59 = vadd.f32 %v1558_v56, %v2099_v20  ;;  %v1094_v60 = vpop.f32.mrb[35].mxu1 }
 0x4ec   :  { %1658 = vrcp.f32 %v1173_v54  ;;  %v1315_v61 = vmul.f32 -1.442695, %v1092_v55  ;;  %v1095_v62 = vadd.f32 %v2099_v20, %v1094_v60 }
 0x4ed   :  { %1660 = vrcp.f32 %v1171_v57  ;;  %v1318_v63 = vmul.f32 -1.442695, %v1103_v59 }
 0x4ee   :  { %1662 = vpow2.f32 %v1317_v58  ;;  %v1316_v0 = vmul.f32 -1.442695, %v1095_v62 }
 0x4ef   :  { %v1647_v1 = vpop.eup %1646  ;;  %1664 = vpow2.f32 %v1315_v61 }
 0x4f0   :  { %v1649_v2 = vpop.eup %1648  ;;  %v1176_v3 = vadd.f32 1.0, %v1647_v1  ;;  %1666 = vpow2.f32 %v1318_v63  ;;  %v1561_v4 = vpop.f32.mrb[36].mxu1 }
 0x4f1   :  { %v1651_v5 = vpop.eup %1650  ;;  %v1174_v6 = vadd.f32 1.0, %v1649_v2  ;;  %1668 = vpow2.f32 %v1316_v0  ;;  %v1116_v7 = vadd.f32 %v1561_v4, %v2099_v20  ;;  %v1107_v8 = vpop.f32.mrb[37].mxu1 }
 0x4f2   :  { %v1653_v9 = vpop.eup %1652  ;;  %1670 = vrcp.f32 %v1176_v3  ;;  %v1177_v10 = vadd.f32 1.0, %v1651_v5  ;;  %v1108_v11 = vadd.f32 %v2099_v20, %v1107_v8  ;;  %v1562_v12 = vpop.f32.mrb[38].mxu1 }
 0x4f3   :  { %1672 = vrcp.f32 %v1174_v6  ;;  %v1175_v13 = vadd.f32 1.0, %v1653_v9  ;;  %v1321_v14 = vmul.f32 -1.442695, %v1116_v7  ;;  %v1119_v15 = vadd.f32 %v1562_v12, %v2099_v20  ;;  %v1110_v16 = vpop.f32.mrb[39].mxu1 }
 0x4f4   :  { %v1655_v17 = vpop.eup %1654  ;;  %1674 = vrcp.f32 %v1177_v10  ;;  %v1319_v18 = vmul.f32 -1.442695, %v1108_v11  ;;  %v1111_v19 = vadd.f32 %v2099_v20, %v1110_v16 }
 0x4f5   :  { %v1657_v21 = vpop.eup %1656  ;;  %1220 = vst [vmem:[#allocation13 + $0x10] sm:$0xff] %v1655_v17  ;;  %1676 = vrcp.f32 %v1175_v13  ;;  %v1322_v22 = vmul.f32 -1.442695, %v1119_v15 }
 0x4f6   :  { %v1659_v23 = vpop.eup %1658  ;;  %1218 = vst [vmem:[#allocation13] sm:$0xff] %v1657_v21  ;;  %1678 = vpow2.f32 %v1321_v14  ;;  %v1320_v24 = vmul.f32 -1.442695, %v1111_v19 }
 0x4f7   :  { %v1661_v25 = vpop.eup %1660  ;;  %1221 = vst [vmem:[#allocation13 + $0x18] sm:$0xff] %v1659_v23  ;;  %1680 = vpow2.f32 %v1319_v18 }
 0x4f8   :  { %v1663_v26 = vpop.eup %1662  ;;  %1219 = vst [vmem:[#allocation13 + $0x8] sm:$0xff] %v1661_v25  ;;  %1682 = vpow2.f32 %v1322_v22 }
 0x4f9   :  { %v1665_v27 = vpop.eup %1664  ;;  %v1180_v28 = vadd.f32 1.0, %v1663_v26  ;;  %1684 = vpow2.f32 %v1320_v24 }
 0x4fa   :  { %v1667_v29 = vpop.eup %1666  ;;  %v1178_v30 = vadd.f32 1.0, %v1665_v27 }
 0x4fb   :  { %v1669_v20 = vpop.eup %1668  ;;  %1686 = vrcp.f32 %v1180_v28  ;;  %v1181_v31 = vadd.f32 1.0, %v1667_v29 }
 0x4fc   :  { %v1671_v32 = vpop.eup %1670  ;;  %1688 = vrcp.f32 %v1178_v30  ;;  %v1179_v33 = vadd.f32 1.0, %v1669_v20 }
 0x4fd   :  { %v1673_v34 = vpop.eup %1672  ;;  %1224 = vst [vmem:[#allocation13 + $0x30] sm:$0xff] %v1671_v32  ;;  %1690 = vrcp.f32 %v1181_v31 }
 0x4fe   :  { %v1675_v35 = vpop.eup %1674  ;;  %1222 = vst [vmem:[#allocation13 + $0x20] sm:$0xff] %v1673_v34  ;;  %1692 = vrcp.f32 %v1179_v33 }
 0x4ff   :  { %v1677_v36 = vpop.eup %1676  ;;  %1225 = vst [vmem:[#allocation13 + $0x38] sm:$0xff] %v1675_v35 }
 0x500   :  { %v1679_v37 = vpop.eup %1678  ;;  %1223 = vst [vmem:[#allocation13 + $0x28] sm:$0xff] %v1677_v36 }
 0x501   :  { %v1681_v38 = vpop.eup %1680  ;;  %v1184_v39 = vadd.f32 1.0, %v1679_v37 }
 0x502   :  { %v1683_v40 = vpop.eup %1682  ;;  %v1182_v41 = vadd.f32 1.0, %v1681_v38 }
 0x503   :  { %v1685_v42 = vpop.eup %1684  ;;  %1694 = vrcp.f32 %v1184_v39  ;;  %v1185_v43 = vadd.f32 1.0, %v1683_v40 }
 0x504   :  { %1696 = vrcp.f32 %v1182_v41  ;;  %v1183_v44 = vadd.f32 1.0, %v1685_v42 }
 0x505   :  { %v1687_v45 = vpop.eup %1686  ;;  %1698 = vrcp.f32 %v1185_v43 }
 0x506   :  { %v1689_v46 = vpop.eup %1688  ;;  %1228 = vst [vmem:[#allocation13 + $0x50] sm:$0xff] %v1687_v45  ;;  %1700 = vrcp.f32 %v1183_v44 }
 0x507   :  { %v1691_v47 = vpop.eup %1690  ;;  %1226 = vst [vmem:[#allocation13 + $0x40] sm:$0xff] %v1689_v46 }
 0x508   :  { %v1693_v48 = vpop.eup %1692  ;;  %1229 = vst [vmem:[#allocation13 + $0x58] sm:$0xff] %v1691_v47 }
 0x509   :  { %1227 = vst [vmem:[#allocation13 + $0x48] sm:$0xff] %v1693_v48 }
 0x50d   :  { %v1695_v49 = vpop.eup %1694 }
 0x50e   :  { %v1697_v50 = vpop.eup %1696  ;;  %1232 = vst [vmem:[#allocation13 + $0x70] sm:$0xff] %v1695_v49 }
 0x50f   :  { %v1699_v51 = vpop.eup %1698  ;;  %1230 = vst [vmem:[#allocation13 + $0x60] sm:$0xff] %v1697_v50 }
 0x510   :  { %v1701_v52 = vpop.eup %1700  ;;  %1233 = vst [vmem:[#allocation13 + $0x78] sm:$0xff] %v1699_v51 }
 0x511   :  { %1231 = vst [vmem:[#allocation13 + $0x68] sm:$0xff] %v1701_v52 }
 0x512   :  { %1845 = shalt.err (!%p1842_p10)
}
 0x513   :  { %s1846_s21 = scalar_lea.hbm %s2140_s11, 2048 }
 0x514   :  { %p1847_p11 = scmp.ne.s32.totalorder %s2140_s11, %s1846_s21  ;;  %p1850_p12 = scmp.lt.u32.totalorder %s1846_s21, %s2140_s11 }
 0x516   :  { %p1852_p13 = pnand %p1850_p12, %p1847_p11 }
 0x518   :  { %1855 = shalt.err (!%p1852_p13)
}
 0x519   :  { %s1875_s1 = smov 128   ;;  %s1876_s18 = smov 8  }
 0x51a   :  { %1245 = dma.vmem_to_hbm [thread:$0]  %s1240_s17, 2048, %s2140_s11, [#allocation4], %s1875_s1, %s1875_s1, %s1876_s18  }
 0x51b   :  { %1864 = dma.done.wait [#allocation4], 2048  }
 0x51c   :  { %1865 = vsyncadd [#allocation4], 4294965248 }
 0x51d   :  { %1249 = vsyncpa [#allocation3], 1 }
 0x51e   :  { %1250 = vsyncpa [#allocation6], 1 }
 0x51f   :  { %1251 = vsyncpa [#allocation9], 1 }
 0x520   :  { %1252 = vsyncpa [#allocation12], 1 }
 0x521   :  { %1253 = vsyncpa [#allocation4], 1 }

</bundles_post_ra>
